<compile_context>
chip_gen: v5e
topology: v5e:2x2
jax: 0.10.0
libtpu: 0.0.40
codegen_flags: <defaults>
</compile_context>

<pallas_src>
import jax
import jax.numpy as jnp
from jax.experimental import pallas as pl
from jax.experimental.pallas import tpu as pltpu

_LANES = 128
_SUBLANES = 8


def _round_up(x, m):
    return ((x + m - 1) // m) * m


def _choose_tiling(rows, max_tile_rows, row_align):
    """Pick (tile_rows, rows_padded).

    Guarantees: tile_rows % row_align == 0 and rows_padded % tile_rows == 0.
    Prefers rows_padded == rows (zero-copy: the flat input is viewed as
    (rows, 128) and fed straight to pallas_call); otherwise the wrapper falls
    back to a zero-padded copy.
    """
    rows = max(rows, 1)
    max_t = max(row_align, (max_tile_rows // row_align) * row_align)
    if rows <= max_t:
        t = _round_up(rows, row_align)
        return t, t                                  # single tile
    if rows % row_align == 0:
        # Largest aligned divisor of `rows` that fits the tile budget -> exact,
        # zero-copy tiling.  Reject pathologically small divisors (per-step
        # overhead would dominate) and pad instead.
        t = max_t
        while t >= row_align and rows % t != 0:
            t -= row_align
        if t >= row_align and rows % t == 0 and t >= min(512, max_t):
            return t, rows
    # Ragged: pad the row count up to a multiple of a full-size tile.
    return max_t, _round_up(rows, max_t)


def _tile_sum_kernel(ll_ref, lc_ref, out_ref):
    # ll_ref / lc_ref : VMEM (tile_rows, 128) blocks in their *native* dtype
    #                   (one contiguous DMA per stream per step).
    # out_ref         : VMEM (1, 16, 128) f32 per-tile partial sums
    #                   (rows 0:8 = loss_l, rows 8:16 = loss_c) — lane-dense.
    # Up-cast in-kernel, then fold the row tile into vreg-shaped (8, 128)
    # groups: pure VPU elementwise adds, no cross-lane (XLU) work at all.
    ll = ll_ref[...].astype(jnp.float32)
    lc = lc_ref[...].astype(jnp.float32)
    out_ref[0, 0:_SUBLANES, :] = jnp.sum(ll.reshape(-1, _SUBLANES, _LANES), axis=0)
    out_ref[0, _SUBLANES:2 * _SUBLANES, :] = jnp.sum(
        lc.reshape(-1, _SUBLANES, _LANES), axis=0)


def mimic_loss_post(loss_l, loss_c, N, loss_mimic, weight_ratio, *, max_tile_rows=4096):
    """Pallas implementation of MimicLossPost.forward.

    Args:
      loss_l: any-shape float array of localization loss terms (native dtype kept).
      loss_c: same-size float array of classification loss terms.
      N:      matched-prior counts (any shape / numeric dtype).
      loss_mimic: scalar mimic loss.
      weight_ratio: length-3 sequence (cfg.LOSS.WEIGHT_RATIO); index 0 unused.
      max_tile_rows: row budget per tile.  Default 4096 rows -> 2 MiB/stream
        f32 block, 8 MiB double-buffered for both streams: fits the scoped-VMEM
        defaults on every generation (v5e 16 MiB, v6e 32 MiB, v7x 32 MiB).

    Returns:
      (loss, (loss_l_norm, loss_c_norm, loss_mimic)) — scalars.
    """
    ll_flat = jnp.reshape(loss_l, (-1,))
    lc_flat = jnp.reshape(loss_c, (-1,))
    assert ll_flat.size == lc_flat.size, "loss_l / loss_c must have the same size"
    total = ll_flat.size

    # Sub-32-bit dtypes pack along sublanes: keep block rows aligned to the
    # packed sublane count (f32 -> 8, bf16 -> 16, int8/fp8 -> 32).
    row_align = _SUBLANES * max(
        1,
        4 // jnp.dtype(ll_flat.dtype).itemsize,
        4 // jnp.dtype(lc_flat.dtype).itemsize,
    )

    rows = pl.cdiv(max(total, 1), _LANES)
    tile_rows, rows_padded = _choose_tiling(rows, max_tile_rows, row_align)
    num_tiles = rows_padded // tile_rows
    padded_total = rows_padded * _LANES

    allow_fusion = None
    if padded_total == total:
        # Zero-copy fast path: flat reshape to a lane-dense (rows, 128) view.
        ll2 = ll_flat.reshape(rows_padded, _LANES)
        lc2 = lc_flat.reshape(rows_padded, _LANES)
    else:
        # Ragged fallback: zero-pad (benign for the sums).  allow_input_fusion
        # lets XLA fold the pad/reshape producer into the Pallas call.
        pad = padded_total - total
        ll2 = jnp.pad(ll_flat, (0, pad)).reshape(rows_padded, _LANES)
        lc2 = jnp.pad(lc_flat, (0, pad)).reshape(rows_padded, _LANES)
        allow_fusion = [True, True]

    partials = pl.pallas_call(
        _tile_sum_kernel,
        out_shape=jax.ShapeDtypeStruct((num_tiles, 2 * _SUBLANES, _LANES), jnp.float32),
        grid=(num_tiles,),
        in_specs=[
            pl.BlockSpec((tile_rows, _LANES), lambda i: (i, 0)),   # loss_l stream
            pl.BlockSpec((tile_rows, _LANES), lambda i: (i, 0)),   # loss_c stream
        ],
        out_specs=pl.BlockSpec((1, 2 * _SUBLANES, _LANES), lambda i: (i, 0, 0)),
        compiler_params=pltpu.CompilerParams(
            # Per-tile outputs carry no cross-iteration state, so the whole
            # grid is "parallel": v7x can shard the tiles across its two
            # TensorCores; v5e/v6e just run the same sequential loop.
            dimension_semantics=("parallel",),
            allow_input_fusion=allow_fusion,
        ),
    )(ll2, lc2)

    # Tiny final combine + 6-op normalization epilogue in plain JAX (per review).
    sums = jnp.sum(partials.reshape(num_tiles, 2, _SUBLANES, _LANES), axis=(0, 2, 3))
    ll_sum, lc_sum = sums[0], sums[1]

    n_sum = jnp.sum(jnp.asarray(N, jnp.float32))         # N.data.sum(): few scalars
    wr = jnp.asarray(weight_ratio, jnp.float32).reshape(-1)
    inv_n = 1.0 / n_sum                                   # sum/(N/w) == sum*w*(1/N)
    loss_l_norm = ll_sum * wr[1] * inv_n
    loss_c_norm = lc_sum * wr[2] * inv_n
    mimic = jnp.asarray(loss_mimic, jnp.float32).reshape(())
    loss = loss_l_norm + loss_c_norm + mimic * 10.0
    return loss, (loss_l_norm, loss_c_norm, mimic)


def _reference(loss_l, loss_c, N, loss_mimic, weight_ratio):
    n_sum = jnp.sum(jnp.asarray(N, jnp.float32))
    ll = jnp.sum(jnp.asarray(loss_l, jnp.float32)) / (n_sum / weight_ratio[1])
    lc = jnp.sum(jnp.asarray(loss_c, jnp.float32)) / (n_sum / weight_ratio[2])
    loss = ll + lc + jnp.asarray(loss_mimic, jnp.float32) * 10.0
    return loss, ll, lc


def _check(B, P, weight_ratio, seed, dtype=jnp.float32, **kw):
    key = jax.random.PRNGKey(seed)
    k1, k2, k3, k4 = jax.random.split(key, 4)
    loss_l = jax.random.uniform(k1, (B, P), dtype=jnp.float32).astype(dtype)
    loss_c = jax.random.uniform(k2, (B, P), dtype=jnp.float32).astype(dtype)
    N = jax.random.randint(k3, (B,), 1, 8).astype(jnp.float32)
    loss_mimic = jax.random.uniform(k4, (), dtype=jnp.float32)

    loss, (ll, lc, mimic_out) = mimic_loss_post(loss_l, loss_c, N, loss_mimic,
                                                weight_ratio, **kw)
    jax.block_until_ready((loss, ll, lc, mimic_out))

    ref_loss, ref_ll, ref_lc = _reference(loss_l, loss_c, N, loss_mimic, weight_ratio)
    assert jnp.allclose(loss, ref_loss, rtol=1e-4, atol=1e-5), (loss, ref_loss)
    assert jnp.allclose(ll, ref_ll, rtol=1e-4, atol=1e-5), (ll, ref_ll)
    assert jnp.allclose(lc, ref_lc, rtol=1e-4, atol=1e-5), (lc, ref_lc)
    assert jnp.allclose(mimic_out, loss_mimic)


if __name__ == "__main__":
    # cfg.LOSS.WEIGHT_RATIO (index 0 unused by the forward, matching the module).
    weight_ratio = (1.0, 2.0, 4.0)

    # Small, 128-aligned shape: zero-copy single-tile fast path (grid of 1).
    _check(B=2, P=1024, weight_ratio=weight_ratio, seed=0)

    # bf16 inputs (native-dtype DMA + in-kernel up-cast) with a deliberately
    # small tile budget to exercise the multi-tile "parallel" grid (grid > 1).
    _check(B=4, P=4096, weight_ratio=weight_ratio, seed=0,
           dtype=jnp.bfloat16, max_tile_rows=64)

    # Ragged element count: padded fallback path (allow_input_fusion).
    _check(B=2, P=1000, weight_ratio=weight_ratio, seed=0)

    print("KERNEL_OK")
</pallas_src>

<mosaic_0001>
module attributes {stable_mosaic.version = 11 : i64} {
  func.func @_tile_sum_kernel(%arg0: i32, %arg1: memref<16x128xf32, #tpu.memory_space<vmem>>, %arg2: memref<16x128xf32, #tpu.memory_space<vmem>>, %arg3: memref<1x16x128xf32, #tpu.memory_space<vmem>>) attributes {dimension_semantics = [#tpu.dimension_semantics<parallel>], iteration_bounds = array<i64: 1>, scalar_prefetch = 0 : i64, scratch_operands = 0 : i64, tpu.core_type = #tpu.core_type<tc>, window_params = [{transform_indices = @transform_0, window_bounds = array<i64: 16, 128>}, {transform_indices = @transform_1, window_bounds = array<i64: 16, 128>}, {transform_indices = @transform_2, window_bounds = array<i64: 1, 16, 128>}]} {
    %c0 = arith.constant 0 : index
    %c0_0 = arith.constant 0 : index
    %0 = vector.load %arg1[%c0, %c0_0] : memref<16x128xf32, #tpu.memory_space<vmem>>, vector<16x128xf32>
    %c0_1 = arith.constant 0 : index
    %c0_2 = arith.constant 0 : index
    %1 = vector.load %arg2[%c0_1, %c0_2] : memref<16x128xf32, #tpu.memory_space<vmem>>, vector<16x128xf32>
    %2 = vector.shape_cast %0 : vector<16x128xf32> to vector<2x8x128xf32>
    %cst = arith.constant dense<0.000000e+00> : vector<8x128xf32>
    %3 = vector.multi_reduction <add>, %2, %cst [0] : vector<2x8x128xf32> to vector<8x128xf32>
    %c0_3 = arith.constant 0 : index
    %c0_4 = arith.constant 0 : index
    %c0_5 = arith.constant 0 : index
    %4 = vector.load %arg3[%c0_3, %c0_4, %c0_5] : memref<1x16x128xf32, #tpu.memory_space<vmem>>, vector<1x8x128xf32>
    %5 = vector.shape_cast %4 : vector<1x8x128xf32> to vector<8x128xf32>
    %6 = vector.shape_cast %3 : vector<8x128xf32> to vector<1x8x128xf32>
    tpu.vector_store %arg3[%c0_3, %c0_4, %c0_5], %6 {strides = array<i32>} : memref<1x16x128xf32, #tpu.memory_space<vmem>>, vector<1x8x128xf32>,
    %7 = vector.shape_cast %1 : vector<16x128xf32> to vector<2x8x128xf32>
    %cst_6 = arith.constant dense<0.000000e+00> : vector<8x128xf32>
    %8 = vector.multi_reduction <add>, %7, %cst_6 [0] : vector<2x8x128xf32> to vector<8x128xf32>
    %c0_7 = arith.constant 0 : index
    %c8 = arith.constant 8 : index
    %c0_8 = arith.constant 0 : index
    %9 = vector.load %arg3[%c0_7, %c8, %c0_8] : memref<1x16x128xf32, #tpu.memory_space<vmem>>, vector<1x8x128xf32>
    %10 = vector.shape_cast %9 : vector<1x8x128xf32> to vector<8x128xf32>
    %11 = vector.shape_cast %8 : vector<8x128xf32> to vector<1x8x128xf32>
    tpu.vector_store %arg3[%c0_7, %c8, %c0_8], %11 {strides = array<i32>} : memref<1x16x128xf32, #tpu.memory_space<vmem>>, vector<1x8x128xf32>,
    return
  }
  func.func @transform_0(%arg0: i32) -> (i32, i32) {
    %c0_i32 = arith.constant 0 : i32
    %c0_i32_0 = arith.constant 0 : i32
    return %arg0, %c0_i32 : i32, i32
  }
  func.func @transform_1(%arg0: i32) -> (i32, i32) {
    %c0_i32 = arith.constant 0 : i32
    %c0_i32_0 = arith.constant 0 : i32
    return %arg0, %c0_i32 : i32, i32
  }
  func.func @transform_2(%arg0: i32) -> (i32, i32, i32) {
    %c0_i32 = arith.constant 0 : i32
    %c0_i32_0 = arith.constant 0 : i32
    %c0_i32_1 = arith.constant 0 : i32
    return %arg0, %c0_i32, %c0_i32_0 : i32, i32, i32
  }
}

</mosaic_0001>

<bundles_post_ra>
// kernel: tpu_custom_call.1
= control target key start
LH: loop header
LB: loop body
LE: loop exit
PB: predicated region body
PF: predicated region fallthrough
CT: control target
= control target key end

     0   :  { %7 = vsyncpa [#allocation3], 0  ;;  %s184_s0 = inlined_call_operand.hbm [shape: f32[16,128], index: 0, kind: input, shape index: {}]   ;;  %s185_s1 = inlined_call_operand.hbm [shape: f32[16,128], index: 1, kind: input, shape index: {}]   ;;  %s186_s2 = inlined_call_operand.hbm [shape: f32[1,16,128], index: 2, kind: output, shape index: {}]  }
   0x1   :  { %8 = vsyncpa [#allocation6], 0 }
   0x2   :  { %9 = vsyncpa [#allocation4], 0  ;;  %s14_s11 = sshll.u32 %s184_s0, 4  ;;  %s155_s12 = smov [#allocation2]   ;;  %s15_s11 = int_to_ptr.hbm [resolvable:$true] %s14_s11 }
   0x3   :  { %s16_s13 = sshll.u32 %s155_s12, 4  ;;  %s27_s16 = sshll.u32 %s185_s1, 4  ;;  %s17_s13 = int_to_ptr.vmem [resolvable:$true] %s16_s13  ;;  %s28_s16 = int_to_ptr.hbm [resolvable:$true] %s27_s16 }
   0x4   :  { %s156_s17 = smov 128   ;;  %s157_s18 = smov 8  }
   0x5   :  { %22 = dma.hbm_to_vmem [thread:$0]  %s15_s11, 256, %s17_s13, [#allocation3], %s156_s17, %s156_s17, %s157_s18  }
   0x6   :  { %s158_s19 = smov [#allocation5]  }
   0x7   :  { %s29_s20 = sshll.u32 %s158_s19, 4  ;;  %s30_s20 = int_to_ptr.vmem [resolvable:$true] %s29_s20 }
   0x8   :  { %35 = dma.hbm_to_vmem [thread:$0]  %s28_s16, 256, %s30_s20, [#allocation6], %s156_s17, %s156_s17, %s157_s18  }
   0x9   :  { %149 = dma.done.wait [#allocation3], 256  }
   0xa   :  { %150 = vsyncadd [#allocation3], 4294967040 }
   0xb   :  { %151 = dma.done.wait [#allocation6], 256  }
   0xc   :  { %152 = vsyncadd [#allocation6], 4294967040  ;;  %s159_s0 = smov [#allocation7]   ;;  %s58_s24 = sshll.u32 %s186_s2, 4  ;;  %v44_v0 = vld [vmem:[#allocation2] sm:$0xff]  ;;  %v45_v1 = vld [vmem:[#allocation2 + $0x8] sm:$0xff]  ;;  %s59_s24 = int_to_ptr.hbm [resolvable:$true] %s58_s24 }
   0xd   :  { %s56_s21 = sshll.u32 %s159_s0, 4  ;;  %v46_v2 = vld [vmem:[#allocation5] sm:$0xff]  ;;  %v48_v3 = vadd.f32 %v45_v1, %v44_v0  ;;  %v47_v4 = vld [vmem:[#allocation5 + $0x8] sm:$0xff]  ;;  %s57_s21 = int_to_ptr.vmem [resolvable:$true] %s56_s21 }
   0xe   :  { %v50_v5 = vadd.f32 %v47_v4, %v46_v2 }
   0xf   :  { %49 = vst [vmem:[#allocation7] sm:$0xff] %v48_v3 }
  0x10   :  { %51 = vst [vmem:[#allocation7 + $0x8] sm:$0xff] %v50_v5 }
  0x11   :  { %64 = dma.vmem_to_hbm [thread:$0]  %s57_s21, 256, %s59_s24, [#allocation4], %s156_s17, %s156_s17, %s157_s18  }
  0x12   :  { %153 = dma.done.wait [#allocation4], 256  }
  0x13   :  { %154 = vsyncadd [#allocation4], 4294967040 }
  0x14   :  { %69 = vsyncpa [#allocation3], 1 }
  0x15   :  { %70 = vsyncpa [#allocation6], 1 }
  0x16   :  { %71 = vsyncpa [#allocation4], 1 }

</bundles_post_ra>
